<compile_context>
chip_gen: v7x
topology: tpu7x:2x2x1
jax: 0.10.0
libtpu: 0.0.40
codegen_flags: <defaults>
</compile_context>

<pallas_src>
import functools

import jax
import jax.numpy as jnp
from jax import lax
from jax.experimental import pallas as pl
from jax.experimental.pallas import tpu as pltpu


# ----------------------------- kernel helpers ------------------------------

def _ln(v, w, b, eps=1e-5):
    # LayerNorm over last dim (PyTorch F.layer_norm semantics, eps=1e-5), f32.
    mu = jnp.mean(v, axis=-1, keepdims=True)
    var = jnp.mean((v - mu) ** 2, axis=-1, keepdims=True)
    return (v - mu) * lax.rsqrt(var + eps) * w + b


# ------------------------------ Pallas kernels ------------------------------

def embed_kernel(p_ref, w_ref, o_ref):
    # Patch embedding: (rows, C*ph*pw) @ (C*ph*pw, D) == Conv2d(stride=patch).
    # Patches arrive already in bf16 (halves the HBM read of the patch stream).
    o_ref[...] = jnp.dot(p_ref[...], w_ref[...],
                         preferred_element_type=jnp.float32)


def blocks_kernel(x_hbm, pos_ref, pre_ref, vec_ref, wqkv_ref, bqkv_ref,
                  wo_ref, wfc_ref, bfc_ref, wpj_ref, o_ref, dma_sem,
                  *, n_head, valid_len):
    """All ResidualAttentionBlocks; grid = (batch_tile, layer), layer innermost.

    The activation is held in the output block (same block index across the
    layer axis => VMEM-resident accumulator).  The raw token tensor x_hbm is an
    HBM (ANY) ref that is DMA'd in only at l == 0, where the positional add and
    ln_pre are fused.  Per-layer weights are selected by the layer coordinate.
    """
    b = pl.program_id(0)
    l = pl.program_id(1)
    Bt, Lp, D = o_ref.shape
    rows = Bt * Lp
    dh = D // n_head

    @pl.when(l == 0)
    def _init():
        cp = pltpu.make_async_copy(x_hbm.at[pl.ds(b * Bt, Bt)], o_ref, dma_sem)
        cp.start()
        cp.wait()
        # Fused positional-embedding add + ln_pre.
        o_ref[...] = _ln(o_ref[...] + pos_ref[...][None],
                         pre_ref[0:1, :], pre_ref[1:2, :])

    # Packed per-layer vectors: [ln1_w, ln1_b, bo, ln2_w, ln2_b, b_pj, 0, 0].
    vec = vec_ref[0]
    ln1w, ln1b = vec[0:1, :], vec[1:2, :]
    bo = vec[2:3, :]
    ln2w, ln2b = vec[3:4, :], vec[4:5, :]
    bpj = vec[5:6, :]

    x = o_ref[...].reshape(rows, D)                 # (Bt*Lp, D) f32 residual

    # --- attention branch ----------------------------------------------------
    h = _ln(x, ln1w, ln1b)
    # Fused QKV projection (q-scale dh**-0.5 already folded into wqkv / bqkv).
    qkv = jnp.dot(h.astype(jnp.bfloat16), wqkv_ref[0],
                  preferred_element_type=jnp.float32) + bqkv_ref[0]
    qkv = qkv.reshape(Bt, Lp, 3 * D)

    # Additive key-padding bias, hoisted out of the head loop.
    if valid_len < Lp:
        kbias = jnp.where(
            lax.broadcasted_iota(jnp.int32, (1, 1, Lp), 2) < valid_len,
            0.0, -1e30)
    else:
        kbias = None

    wo = wo_ref[0]
    attn = jnp.zeros((rows, D), jnp.float32) + bo   # start from out-proj bias
    for i in range(n_head):                         # static unroll over heads
        lo = i * dh
        q = qkv[:, :, lo:lo + dh].astype(jnp.bfloat16)
        k = qkv[:, :, D + lo:D + lo + dh].astype(jnp.bfloat16)
        v = qkv[:, :, 2 * D + lo:2 * D + lo + dh].astype(jnp.bfloat16)
        s = jnp.einsum('bqd,bkd->bqk', q, k,
                       preferred_element_type=jnp.float32)     # (Bt, Lp, Lp)
        if kbias is not None:
            s = s + kbias
        s = s - jnp.max(s, axis=-1, keepdims=True)
        e = jnp.exp(s)
        p = e * pl.reciprocal(jnp.sum(e, axis=-1, keepdims=True), approx=True)
        ctx = jnp.einsum('bqk,bkd->bqd', p.astype(jnp.bfloat16), v,
                         preferred_element_type=jnp.float32)   # (Bt, Lp, dh)
        # Accumulate this head's contribution through its slice of the output
        # projection (no head concatenate; each ctx is consumed immediately).
        attn = attn + jnp.dot(ctx.reshape(rows, dh).astype(jnp.bfloat16),
                              wo[lo:lo + dh, :],
                              preferred_element_type=jnp.float32)
    x = x + attn

    # --- MLP branch (QuickGELU) ----------------------------------------------
    h2 = _ln(x, ln2w, ln2b)
    u = jnp.dot(h2.astype(jnp.bfloat16), wfc_ref[0],
                preferred_element_type=jnp.float32) + bfc_ref[0]
    u = u.astype(jnp.bfloat16)
    u = u * jax.nn.sigmoid(1.702 * u)               # QuickGELU in bf16
    m = jnp.dot(u, wpj_ref[0], preferred_element_type=jnp.float32) + bpj
    o_ref[...] = (x + m).reshape(Bt, Lp, D)


def head_kernel(x_ref, w_ref, b_ref, proj_ref, o_ref):
    # ln_post on the CLS token + output projection.
    v = _ln(x_ref[...], w_ref[...], b_ref[...])
    o_ref[...] = jnp.dot(v.astype(jnp.bfloat16), proj_ref[...],
                         preferred_element_type=jnp.float32)


# ------------------------------- wrappers -----------------------------------

def _vmem_limit_bytes():
    # Derive the scoped-VMEM request from the chip, leaving headroom for
    # compiler scratch (important on v7x where per-core VMEM is only 64 MiB).
    try:
        cap = int(pltpu.get_tpu_info().vmem_capacity_bytes)
    except Exception:
        cap = 64 * 1024 * 1024          # conservative fallback (v7x per-core)
    return int(min(cap - 16 * 1024 * 1024, 100 * 1024 * 1024))


def _pick_batch_tile(B, Lp, D, M, vmem_limit):
    # Double-buffered bf16 per-layer weights + biases.
    wbytes = 2 * 2 * (D * 3 * D + D * D + D * M + M * D + 3 * D + M + 8 * D)
    # Per-image VMEM: resident f32 activation block + big intermediates.
    per_img = Lp * D * 4 + Lp * 3 * D * 4 + Lp * M * 4 + 2 * Lp * Lp * 4
    budget = vmem_limit - wbytes - (4 << 20)
    bt = max(1, min(B, budget // max(per_img, 1)))
    bt = int(min(bt, 16))
    while B % bt:                        # keep the grid exact (no OOB DMA)
        bt -= 1
    return bt


def run_blocks(x, pos, pre_vecs, p, n_head, valid_len, vmem_limit):
    B, Lp, D = x.shape
    layers = p["wqkv"].shape[0]
    M = p["w_fc"].shape[-1]
    Bt = _pick_batch_tile(B, Lp, D, M, vmem_limit)

    def amap(b, l):
        return (b, 0, 0)

    def wmap(b, l):
        return (l, 0, 0)

    def cmap(b, l):
        return (0, 0)

    def wspec(arr):
        return pl.BlockSpec((1,) + arr.shape[1:], wmap)

    weights = [p["vecs"], p["wqkv"], p["bqkv"], p["wo"],
               p["w_fc"], p["b_fc"], p["w_pj"]]

    return pl.pallas_call(
        functools.partial(blocks_kernel, n_head=n_head, valid_len=valid_len),
        grid=(B // Bt, layers),
        in_specs=[pl.BlockSpec(memory_space=pl.ANY),      # raw tokens (HBM)
                  pl.BlockSpec((Lp, D), cmap),            # positional embed
                  pl.BlockSpec((2, D), cmap)]             # ln_pre w/b
                 + [wspec(w) for w in weights],
        out_specs=pl.BlockSpec((Bt, Lp, D), amap),
        out_shape=jax.ShapeDtypeStruct((B, Lp, D), jnp.float32),
        scratch_shapes=[pltpu.SemaphoreType.DMA(())],
        compiler_params=pltpu.CompilerParams(
            dimension_semantics=("parallel", "arbitrary"),
            vmem_limit_bytes=vmem_limit),
    )(x, pos, pre_vecs, *weights)


def image_encoder_forward(image, params, cfg):
    """image: (B, 3, H, W) NCHW float32 -> (B, output_dim) image features."""
    B = image.shape[0]
    ps = cfg["patch_size"]
    D = cfg["width"]
    gh, gw = image.shape[2] // ps, image.shape[3] // ps
    Np = gh * gw
    rows = B * Np
    cin = 3 * ps * ps

    # --- conv1 as patch extraction (glue, bf16) + matmul (Pallas, row-tiled) --
    patches = (image.reshape(B, 3, gh, ps, gw, ps)
                    .transpose(0, 2, 4, 1, 3, 5)
                    .reshape(rows, cin)).astype(jnp.bfloat16)
    rtile = rows if rows <= 512 else 512
    emb = pl.pallas_call(
        embed_kernel,
        grid=(pl.cdiv(rows, rtile),),
        in_specs=[pl.BlockSpec((rtile, cin), lambda i: (i, 0)),
                  pl.BlockSpec((cin, D), lambda i: (0, 0))],
        out_specs=pl.BlockSpec((rtile, D), lambda i: (i, 0)),
        out_shape=jax.ShapeDtypeStruct((rows, D), jnp.float32),
        compiler_params=pltpu.CompilerParams(dimension_semantics=("parallel",)),
    )(patches, params["conv_w"])
    x = emb.reshape(B, Np, D)

    # --- class token + pad sequence to a multiple of 16 (bf16 sublane pack) ---
    cls = jnp.broadcast_to(params["cls"][None], (B, 1, D))
    x = jnp.concatenate([cls, x], axis=1)
    L = Np + 1
    Lp = ((L + 15) // 16) * 16
    pos = params["pos"]
    if Lp != L:
        x = jnp.pad(x, ((0, 0), (0, Lp - L), (0, 0)))
        pos = jnp.pad(pos, ((0, Lp - L), (0, 0)))
    pre_vecs = jnp.concatenate([params["ln_pre_w"], params["ln_pre_b"]], axis=0)

    # --- transformer stack: ONE pallas_call, grid = (B/Bt, layers) ------------
    # (pos add + ln_pre are fused into the l==0 branch inside the kernel)
    vmem_limit = _vmem_limit_bytes()
    x = run_blocks(x, pos, pre_vecs, params, cfg["heads"],
                   valid_len=L, vmem_limit=vmem_limit)

    # --- ln_post on CLS token + projection (Pallas) ---------------------------
    x_cls = x[:, 0, :]
    btile = B if B <= 256 else 256
    out_dim = cfg["output_dim"]
    out = pl.pallas_call(
        head_kernel,
        grid=(pl.cdiv(B, btile),),
        in_specs=[pl.BlockSpec((btile, D), lambda i: (i, 0)),
                  pl.BlockSpec((1, D), lambda i: (0, 0)),
                  pl.BlockSpec((1, D), lambda i: (0, 0)),
                  pl.BlockSpec((D, out_dim), lambda i: (0, 0))],
        out_specs=pl.BlockSpec((btile, out_dim), lambda i: (i, 0)),
        out_shape=jax.ShapeDtypeStruct((B, out_dim), jnp.float32),
        compiler_params=pltpu.CompilerParams(dimension_semantics=("parallel",)),
    )(x_cls, params["ln_post_w"], params["ln_post_b"], params["proj"])
    return out


# ------------------------------ parameters ----------------------------------

def init_params(key, *, width, layers, heads, mlp_ratio, patch_size,
                output_dim, grid_size):
    D, H = width, heads
    dh = D // H
    M = int(D * mlp_ratio)
    L = grid_size[0] * grid_size[1] + 1

    state = [key]

    def nxt():
        state[0], sub = jax.random.split(state[0])
        return sub

    def nrm(shape, s=0.02):
        return (s * jax.random.normal(nxt(), shape)).astype(jnp.float32)

    scale = D ** -0.5
    attn_scale = dh ** -0.5

    params = {
        # Matmul weights stored in bf16 (f32 accumulation inside kernels).
        # NOTE: when porting real PyTorch weights, Conv2d (D,3,ps,ps) must be
        # reshaped/transposed to (3*ps*ps, D) matching the (C, ph, pw) patch
        # flattening order, and Linear weights transposed to (in, out).
        "conv_w": nrm((3 * patch_size * patch_size, D)).astype(jnp.bfloat16),
        "cls": nrm((1, D), scale),                       # class_embedding
        "pos": nrm((L, D), scale),                       # positional_embedding
        "ln_pre_w": jnp.ones((1, D), jnp.float32),
        "ln_pre_b": jnp.zeros((1, D), jnp.float32),
        "ln_post_w": jnp.ones((1, D), jnp.float32),
        "ln_post_b": jnp.zeros((1, D), jnp.float32),
        "proj": nrm((D, output_dim), scale).astype(jnp.bfloat16),
    }

    # Per-layer weights stacked along a leading layer axis.  The attention
    # q-scale dh**-0.5 is folded into the q columns of wqkv / bqkv (matches
    # the reference "q *= scale" in exact math).
    wqkv, bqkv = [], []
    for _ in range(layers):
        wq, wk, wv = nrm((D, D)) * attn_scale, nrm((D, D)), nrm((D, D))
        wqkv.append(jnp.concatenate([wq, wk, wv], axis=1))
        bq = jnp.zeros((D,), jnp.float32) * attn_scale
        bqkv.append(jnp.concatenate([bq, jnp.zeros((2 * D,), jnp.float32)])[None])

    # Small per-layer vectors packed into one (layers, 8, D) array:
    # rows = [ln1_w, ln1_b, bo, ln2_w, ln2_b, b_pj, pad, pad].
    ones_l = jnp.ones((layers, D), jnp.float32)
    zeros_l = jnp.zeros((layers, D), jnp.float32)
    vecs = jnp.stack([ones_l, zeros_l, zeros_l, ones_l, zeros_l, zeros_l,
                      zeros_l, zeros_l], axis=1)

    params.update({
        "vecs": vecs,
        "wqkv": jnp.stack(wqkv).astype(jnp.bfloat16),
        "bqkv": jnp.stack(bqkv),                                 # (layers,1,3D)
        "wo": jnp.stack([nrm((D, D)) for _ in range(layers)]).astype(jnp.bfloat16),
        "w_fc": jnp.stack([nrm((D, M)) for _ in range(layers)]).astype(jnp.bfloat16),
        "b_fc": jnp.zeros((layers, 1, M), jnp.float32),
        "w_pj": jnp.stack([nrm((M, D)) for _ in range(layers)]).astype(jnp.bfloat16),
    })
    return params


# --------------------------------- main --------------------------------------

if __name__ == "__main__":
    # Small config consistent with the module:
    #   vision_cfg: image_size=32, patch_size=8, width=32, head_width=16
    #               (=> heads=2), layers=2, mlp_ratio=4.0, teacher_width=-1
    #   embed_dim (output_dim) = 32, quick_gelu=True
    cfg = dict(image_size=32, patch_size=8, width=32, heads=2, layers=2,
               mlp_ratio=4.0, output_dim=32)
    gh = cfg["image_size"] // cfg["patch_size"]
    cfg["grid_size"] = (gh, gh)

    key = jax.random.PRNGKey(0)
    pkey, xkey = jax.random.split(key)
    params = init_params(
        pkey, width=cfg["width"], layers=cfg["layers"], heads=cfg["heads"],
        mlp_ratio=cfg["mlp_ratio"], patch_size=cfg["patch_size"],
        output_dim=cfg["output_dim"], grid_size=cfg["grid_size"])

    # PyTorch-convention NCHW input.
    image = jax.random.normal(xkey, (2, 3, cfg["image_size"], cfg["image_size"]),
                              dtype=jnp.float32)

    feats = image_encoder_forward(image, params, cfg)
    feats = jax.block_until_ready(feats)
    assert feats.shape == (2, cfg["output_dim"])
    assert bool(jnp.all(jnp.isfinite(feats)))
    print("KERNEL_OK")
</pallas_src>

<mosaic_0001>
module attributes {stable_mosaic.version = 11 : i64} {
  func.func @embed_kernel(%arg0: i32, %arg1: memref<32x192xbf16, #tpu.memory_space<vmem>>, %arg2: memref<192x32xbf16, #tpu.memory_space<vmem>>, %arg3: memref<32x32xf32, #tpu.memory_space<vmem>>) attributes {dimension_semantics = [#tpu.dimension_semantics<parallel>], iteration_bounds = array<i64: 1>, scalar_prefetch = 0 : i64, scratch_operands = 0 : i64, tpu.core_type = #tpu.core_type<tc>, window_params = [{transform_indices = @transform_0, window_bounds = array<i64: 32, 192>}, {pipeline_mode = #tpu.pipeline_mode<synchronous>, transform_indices = @transform_1, window_bounds = array<i64: 192, 32>}, {transform_indices = @transform_2, window_bounds = array<i64: 32, 32>}]} {
    %c0 = arith.constant 0 : index
    %c0_0 = arith.constant 0 : index
    %0 = vector.load %arg1[%c0, %c0_0] : memref<32x192xbf16, #tpu.memory_space<vmem>>, vector<32x192xbf16>
    %c0_1 = arith.constant 0 : index
    %c0_2 = arith.constant 0 : index
    %1 = vector.load %arg2[%c0_1, %c0_2] : memref<192x32xbf16, #tpu.memory_space<vmem>>, vector<192x32xbf16>
    %cst = arith.constant dense<0.000000e+00> : vector<32x32xf32>
    %2 = tpu.matmul %0, %1, %cst {dimension_numbers = #tpu.dot_dimension_numbers<[1], [0], [0], [1], [0, 0, 1, 1], [], []>} : vector<32x192xbf16>, vector<192x32xbf16>, vector<32x32xf32> -> vector<32x32xf32>
    %c0_3 = arith.constant 0 : index
    %c0_4 = arith.constant 0 : index
    %3 = vector.load %arg3[%c0_3, %c0_4] : memref<32x32xf32, #tpu.memory_space<vmem>>, vector<32x32xf32>
    tpu.vector_store %arg3[%c0_3, %c0_4], %2 {strides = array<i32>} : memref<32x32xf32, #tpu.memory_space<vmem>>, vector<32x32xf32>,
    return
  }
  func.func @transform_0(%arg0: i32) -> (i32, i32) {
    %c0_i32 = arith.constant 0 : i32
    %c0_i32_0 = arith.constant 0 : i32
    return %arg0, %c0_i32 : i32, i32
  }
  func.func @transform_1(%arg0: i32) -> (i32, i32) {
    %c0_i32 = arith.constant 0 : i32
    %c0_i32_0 = arith.constant 0 : i32
    %c0_i32_1 = arith.constant 0 : i32
    return %c0_i32, %c0_i32_0 : i32, i32
  }
  func.func @transform_2(%arg0: i32) -> (i32, i32) {
    %c0_i32 = arith.constant 0 : i32
    %c0_i32_0 = arith.constant 0 : i32
    return %arg0, %c0_i32 : i32, i32
  }
}

</mosaic_0001>

<bundles_post_ra>
// kernel: tpu_custom_call.1
= control target key start
LH: loop header
LB: loop body
LE: loop exit
PB: predicated region body
PF: predicated region fallthrough
CT: control target
= control target key end

     0   :  { %v296_v1 = vmov 0   ;;  %vm131_vm0 = vcmask 523264   ;;  %s375_s0 = inlined_call_operand.vmem [shape: bf16[32,192], index: 0, kind: input, shape index: {}]   ;;  %s376_s1 = inlined_call_operand.vmem [shape: bf16[192,32], index: 1, kind: input, shape index: {}]   ;;  %s377_s2 = inlined_call_operand.hbm [shape: f32[32,32], index: 2, kind: output, shape index: {}]  }
   0x1   :  { %v254_v0 = vld [vmem:[%s376_s1] sm:$0xff]   ;;  %138 = vmatprep.subr.bf16.mxu0 %v296_v1  ;;  %226 = vmatprep.subr.bf16.mxu1 %v296_v1  ;;  %v255_v2 = vld [vmem:[%s376_s1 + $0x8] sm:$0xff]   ;;  %v256_v3 = vld [vmem:[%s376_s1 + $0x10] sm:$0xff]  }
   0x2   :  { %139 = vmatpush1.bf16.msra.mxu0 %v254_v0  ;;  %238 = vmatpush1.bf16.msra.mxu1 %v254_v0  ;;  %v257_v4 = vld [vmem:[%s376_s1 + $0x18] sm:$0xff]   ;;  %v268_v5 = vld [vmem:[%s375_s0 + $0x4] ss:$8 sps:$4 sm:$0xff]  }
   0x3   :  { %140 = vmatprep.subr.bf16.mxu0 %v296_v1  ;;  %227 = vmatprep.subr.bf16.mxu1 %v296_v1  ;;  %v258_v6 = vld [vmem:[%s376_s1 + $0x20] sm:$0xff]   ;;  %v271_v7 = vld [vmem:[%s375_s0 + $0x14] ss:$8 sps:$4 sm:$0xff]  }
   0x6   :  { %141 = vmatpush1.bf16.msra.mxu0 %v255_v2  ;;  %239 = vmatpush1.bf16.msra.mxu1 %v255_v2 }
   0x7   :  { %142 = vmatprep.subr.bf16.mxu0 %v296_v1  ;;  %228 = vmatprep.subr.bf16.mxu1 %v296_v1 }
   0xa   :  { %143 = vmatpush1.bf16.msra.mxu0 %v256_v3  ;;  %240 = vmatpush1.bf16.msra.mxu1 %v256_v3 }
   0xb   :  { %144 = vmatprep.subr.bf16.mxu0 %v296_v1  ;;  %229 = vmatprep.subr.bf16.mxu1 %v296_v1 }
   0xe   :  { %145 = vmatpush1.bf16.msra.mxu0 %v257_v4  ;;  %241 = vmatpush1.bf16.msra.mxu1 %v257_v4 }
   0xf   :  { %7 = vsyncpa [#allocation3], 0  ;;  %146 = vmatprep.subr.bf16.mxu0 %v296_v1  ;;  %230 = vmatprep.subr.bf16.mxu1 %v296_v1  ;;  %v259_v8 = vld [vmem:[%s376_s1 + $0x28] sm:$0xff]   ;;  %v260_v9 = vld [vmem:[%s376_s1 + $0x30] sm:$0xff]   ;;  %s297_s13 = smov [#allocation2]   ;;  %vm187_vm1 = vcmask 261120  }
  0x10   :  { %224 = vmatprep.mubr.msk.bf16.mxu0 %vm131_vm0, %v268_v5  ;;  %225 = vmatprep.mubr.msk.bf16.mxu1 %vm131_vm0, %v271_v7  ;;  %v261_v10 = vld [vmem:[%s376_s1 + $0x38] sm:$0xff]   ;;  %v262_v11 = vld [vmem:[%s376_s1 + $0x40] sm:$0xff]   ;;  %v263_v12 = vld [vmem:[%s376_s1 + $0x48] sm:$0xff]   ;;  %s197_s14 = sshll.u32 %s297_s13, 4  ;;  %s198_s14 = int_to_ptr.vmem [resolvable:$true] %s197_s14 }
  0x11   :  { %v264_v13 = vld [vmem:[%s376_s1 + $0x50] sm:$0xff]   ;;  %v265_v14 = vld [vmem:[%s376_s1 + $0x58] sm:$0xff]   ;;  %v266_v15 = vld [vmem:[%s375_s0] ss:$8 sps:$4 sm:$0xff]   ;;  %p277_p1 = scmp.lt.s32.totalorder %s198_s14, %s198_s14 }
  0x12   :  { %147 = vmatpush1.bf16.msra.mxu0 %v258_v6  ;;  %242 = vmatpush1.bf16.msra.mxu1 %v258_v6  ;;  %v269_v16 = vld [vmem:[%s375_s0 + $0x10] ss:$8 sps:$4 sm:$0xff]   ;;  %s272_s0 = scalar_lea.vmem %s198_s14, 512 }
  0x13   :  { %148 = vmatprep.subr.bf16.mxu0 %v296_v1  ;;  %231 = vmatprep.subr.bf16.mxu1 %v296_v1  ;;  %p273_p0 = scmp.ne.s32.totalorder %s198_s14, %s272_s0  ;;  %p278_p2 = scmp.lt.s32.totalorder %s272_s0, %s272_s0 }
  0x15   :  { %p279_p3 = por %p278_p2, %p277_p1 }
  0x16   :  { %149 = vmatpush1.bf16.msra.mxu0 %v259_v8  ;;  %243 = vmatpush1.bf16.msra.mxu1 %v259_v8 }
  0x17   :  { %150 = vmatprep.subr.bf16.mxu0 %v296_v1  ;;  %232 = vmatprep.subr.bf16.mxu1 %v296_v1  ;;  %p280_p4 = pnand %p279_p3, %p273_p0 }
  0x1a   :  { %151 = vmatpush1.bf16.msra.mxu0 %v260_v9  ;;  %244 = vmatpush1.bf16.msra.mxu1 %v260_v9 }
  0x1b   :  { %152 = vmatprep.subr.bf16.mxu0 %v296_v1  ;;  %233 = vmatprep.subr.bf16.mxu1 %v296_v1 }
  0x1e   :  { %153 = vmatpush1.bf16.msra.mxu0 %v261_v10  ;;  %245 = vmatpush1.bf16.msra.mxu1 %v261_v10 }
  0x1f   :  { %154 = vmatprep.subr.bf16.mxu0 %v296_v1  ;;  %234 = vmatprep.subr.bf16.mxu1 %v296_v1 }
  0x22   :  { %155 = vmatpush1.bf16.msra.mxu0 %v262_v11  ;;  %246 = vmatpush1.bf16.msra.mxu1 %v262_v11 }
  0x23   :  { %156 = vmatprep.subr.bf16.mxu0 %v296_v1  ;;  %235 = vmatprep.subr.bf16.mxu1 %v296_v1 }
  0x26   :  { %157 = vmatpush1.bf16.msra.mxu0 %v263_v12  ;;  %247 = vmatpush1.bf16.msra.mxu1 %v263_v12 }
  0x27   :  { %158 = vmatprep.subr.bf16.mxu0 %v296_v1  ;;  %236 = vmatprep.subr.bf16.mxu1 %v296_v1 }
  0x2a   :  { %159 = vmatpush1.bf16.msra.mxu0 %v264_v13  ;;  %248 = vmatpush1.bf16.msra.mxu1 %v264_v13 }
  0x2b   :  { %160 = vmatprep.subr.bf16.mxu0 %v296_v1  ;;  %237 = vmatprep.subr.bf16.mxu1 %v296_v1 }
  0x2e   :  { %161 = vmatpush1.bf16.msra.mxu0 %v265_v14  ;;  %249 = vmatpush1.bf16.msra.mxu1 %v265_v14 }
  0x31   :  { %171 = vmatmul.mubr.bf16.vlgmr.msra.gmra.mrb[0].mxu0 %v266_v15  ;;  %179 = vmatmul.mubr.bf16.vlgmr.msra.gmra.mrb[0].mxu1 %v269_v16 }
 0x104   :  { %v172_v17 = vpop.f32.mrb[0].mxu0  ;;  %v180_v18 = vpop.f32.mrb[0].mxu1 }
 0x105   :  { %188 = vst.msk [vmem:[#allocation2] sm:$0xff] %vm187_vm1, %v172_v17  ;;  %190 = vst.msk [vmem:[#allocation2 + $0x10] sm:$0xff] %vm187_vm1, %v180_v18  ;;  %v174_v19 = vpop.f32.mrb[1].mxu0  ;;  %v182_v20 = vpop.f32.mrb[1].mxu1 }
 0x106   :  { %v175_v21 = vpop.f32.mrb[2].mxu0  ;;  %v183_v22 = vpop.f32.mrb[2].mxu1 }
 0x107   :  { %189 = vst.msk [vmem:[#allocation2 + $0x8] sm:$0xff] %vm187_vm1, %v175_v21  ;;  %191 = vst.msk [vmem:[#allocation2 + $0x18] sm:$0xff] %vm187_vm1, %v183_v22  ;;  %v177_v23 = vpop.f32.mrb[3].mxu0  ;;  %v185_v24 = vpop.f32.mrb[3].mxu1 }
 0x108   :  { %283 = shalt.err (!%p280_p4)
}
 0x109   :  { %s284_s16 = scalar_lea.hbm %s377_s2, 512 }
 0x10a   :  { %p285_p5 = scmp.ne.s32.totalorder %s377_s2, %s284_s16  ;;  %p288_p6 = scmp.lt.u32.totalorder %s284_s16, %s377_s2 }
 0x10c   :  { %p290_p7 = pnand %p288_p6, %p285_p5 }
 0x10e   :  { %293 = shalt.err (!%p290_p7)
}
 0x10f   :  { %s298_s21 = smov 128   ;;  %s299_s22 = smov 8  }
 0x110   :  { %203 = dma.vmem_to_hbm [thread:$0]  %s198_s14, 512, %s377_s2, [#allocation3], %s298_s21, %s298_s21, %s299_s22  }
 0x111   :  { %294 = dma.done.wait [#allocation3], 512  }
 0x112   :  { %295 = vsyncadd [#allocation3], 4294966784 }
 0x113   :  { %207 = vsyncpa [#allocation3], 1 }

</bundles_post_ra>
